<compile_context>
chip_gen: v7x
topology: tpu7x:2x2x1
jax: 0.10.0
libtpu: 0.0.40
codegen_flags: <defaults>
</compile_context>

<pallas_src>
import jax
import jax.numpy as jnp
from jax.experimental import pallas as pl
from jax.experimental.pallas import tpu as pltpu


_LANE = 128
_SUBLANE = 8


def _round_up(x, m):
    return (x + m - 1) // m * m


def _largest_divisor_leq(n, k):
    k = max(1, min(n, int(k)))
    for d in range(k, 0, -1):
        if n % d == 0:
            return d
    return 1


def _chip_params():
    """Generation-aware tuning knobs (best effort; conservative fallbacks)."""
    vmem = None
    kind = ""
    try:
        info = pltpu.get_tpu_info()
        vmem = getattr(info, "vmem_capacity_bytes", None)
    except Exception:
        vmem = None
    try:
        kind = jax.devices()[0].device_kind.lower()
    except Exception:
        kind = ""
    if vmem is None:
        # Assume the smaller 64 MiB (v7x-like) unless we recognize a 128 MiB chip.
        vmem = (128 << 20) if ("v5" in kind or "v6" in kind) else (64 << 20)

    if vmem >= (96 << 20):
        # 128 MiB VMEM chips (v5e / v6e): push single-pass further, single TC.
        params = dict(
            target_tile_bytes=6 << 20,
            two_pass_cutoff_bytes=20 << 20,
            vmem_cap_bytes=100 << 20,
            min_grid_steps=1,          # single TensorCore: no batch-tile cap
        )
    else:
        # 64 MiB VMEM chips (v7x): tighter VMEM; 2 TCs -> want >=4 grid steps so
        # each core still double-buffers its own DMA.
        params = dict(
            target_tile_bytes=8 << 20,
            two_pass_cutoff_bytes=9 << 20,
            vmem_cap_bytes=40 << 20,
            min_grid_steps=4,
        )
    # bf16 VPU exists on v6e/v7x; keep the f32 multiply path elsewhere (v5e/unknown).
    params["bf16_mul_ok"] = ("v6" in kind) or ("v7" in kind)
    return params


def _buffered_block_spec(block_shape, index_map, buffers):
    """BlockSpec with requested pipeline depth; silently falls back if unsupported."""
    try:
        return pl.BlockSpec(block_shape, index_map, pipeline_mode=pl.Buffered(buffers))
    except Exception:
        return pl.BlockSpec(block_shape, index_map)


def _pick_batch_tile(B, per_batch_block_bytes, prm, user_bt, vmem_mult):
    """Pick a batch tile that divides B, hits the target tile size and fits VMEM."""
    usable = prm["vmem_cap_bytes"] - (6 << 20)
    if user_bt is not None:
        bt = _largest_divisor_leq(B, user_bt)
    else:
        bt = max(1, prm["target_tile_bytes"] // max(1, per_batch_block_bytes))
        if prm["min_grid_steps"] > 1:
            bt = min(bt, max(1, B // prm["min_grid_steps"]))
        bt = _largest_divisor_leq(B, bt)
    # Never exceed the per-generation VMEM budget (multi-buffered in + out blocks).
    while bt > 1 and vmem_mult * bt * per_batch_block_bytes > usable:
        bt = _largest_divisor_leq(B, bt - 1)
    return bt


# ---------------------------------------------------------------------------
# single-pass kernel: whole (Bt, C, HW) slab per grid step
# ---------------------------------------------------------------------------
def _make_se_kernel(inv_hw, native_dtype_mul):
    def kernel(x_ref, w1_ref, b1_ref, w2_ref, b2_ref, o_ref):
        # global average pool over the spatial (lane) axis, accumulated in f32.
        pooled = jnp.sum(x_ref[...].astype(jnp.float32), axis=-1) * inv_hw   # (Bt, C)

        # squeeze 1x1 conv (== dense over channels) + ReLU
        s = jnp.dot(pooled, w1_ref[...], preferred_element_type=jnp.float32)
        s = jnp.maximum(s + b1_ref[...], 0.0)                                # (Bt, Cr)

        # excite 1x1 conv + hard-sigmoid relu6(x + 3) / 6
        e = jnp.dot(s, w2_ref[...], preferred_element_type=jnp.float32) + b2_ref[...]
        scale = jnp.clip(e + 3.0, 0.0, 6.0) * (1.0 / 6.0)                    # (Bt, C)

        # re-read x_ref (cheap VMEM loads) rather than keeping the block live
        # in vregs across the dense layers.
        x = x_ref[...]
        if native_dtype_mul:
            # bf16 input on a bf16-VPU chip: stay packed for the multiply.
            o_ref[...] = (x * scale.astype(x.dtype)[:, :, None]).astype(o_ref.dtype)
        else:
            o_ref[...] = (x.astype(jnp.float32) * scale[:, :, None]).astype(o_ref.dtype)
    return kernel


def _se_single_pass(x_flat, w1_t, b1_r, w2_t, b2_r, inv_hw, bt, vmem_limit, native_mul):
    B, C, HW = x_flat.shape
    Cr = w1_t.shape[1]
    nb = B // bt
    elem = jnp.dtype(x_flat.dtype).itemsize
    weight_bytes = (C * Cr + Cr * C + Cr + C) * 4
    cost = pl.CostEstimate(
        flops=int(2 * B * C * HW + 4 * B * C * Cr),
        transcendentals=0,
        bytes_accessed=int(2 * B * C * HW * elem + weight_bytes),
    )

    return pl.pallas_call(
        _make_se_kernel(inv_hw, native_mul),
        out_shape=jax.ShapeDtypeStruct((B, C, HW), x_flat.dtype),
        grid_spec=pltpu.PrefetchScalarGridSpec(
            num_scalar_prefetch=0,
            grid=(nb,),
            in_specs=[
                pl.BlockSpec((bt, C, HW), lambda b: (b, 0, 0)),   # x (full C, HW extent)
                pl.BlockSpec((C, Cr), lambda b: (0, 0)),          # w1^T
                pl.BlockSpec((1, Cr), lambda b: (0, 0)),          # b1
                pl.BlockSpec((Cr, C), lambda b: (0, 0)),          # w2^T
                pl.BlockSpec((1, C), lambda b: (0, 0)),           # b2
            ],
            out_specs=pl.BlockSpec((bt, C, HW), lambda b: (b, 0, 0)),
        ),
        compiler_params=pltpu.CompilerParams(
            dimension_semantics=("parallel",),
            vmem_limit_bytes=int(vmem_limit)),
        cost_estimate=cost,
    )(x_flat, w1_t, b1_r, w2_t, b2_r)


# ---------------------------------------------------------------------------
# two-pass path for very large-spatial SE layers: HW axis is tiled
#   pass 1: pooled average (accumulated over HW tiles) -> per-channel scale
#   pass 2: broadcast-multiply, fully parallel over (batch, HW) tiles
# ---------------------------------------------------------------------------
def _make_pool_scale_kernel(inv_hw):
    def kernel(x_ref, w1_ref, b1_ref, w2_ref, b2_ref, scale_ref, acc_ref):
        # NOTE: acc_ref carries the partial pooled sum across the HW grid axis;
        # that axis MUST stay the innermost ("arbitrary") grid axis so each batch
        # tile's HW iterations run consecutively on the same core.
        hwi = pl.program_id(1)

        @pl.when(hwi == 0)
        def _():
            acc_ref[...] = jnp.zeros_like(acc_ref)

        acc_ref[...] += jnp.sum(x_ref[...].astype(jnp.float32), axis=-1)     # (Bt, C)

        @pl.when(hwi == pl.num_programs(1) - 1)
        def _():
            pooled = acc_ref[...] * inv_hw
            s = jnp.dot(pooled, w1_ref[...], preferred_element_type=jnp.float32)
            s = jnp.maximum(s + b1_ref[...], 0.0)
            e = jnp.dot(s, w2_ref[...], preferred_element_type=jnp.float32) + b2_ref[...]
            scale_ref[0] = jnp.clip(e + 3.0, 0.0, 6.0) * (1.0 / 6.0)
    return kernel


def _make_scale_mul_kernel(native_dtype_mul):
    def kernel(scale_ref, x_ref, o_ref):
        x = x_ref[...]
        if native_dtype_mul:
            o_ref[...] = (x * scale_ref[0].astype(x.dtype)[:, :, None]).astype(o_ref.dtype)
        else:
            o_ref[...] = (x.astype(jnp.float32) * scale_ref[0][:, :, None]).astype(o_ref.dtype)
    return kernel


def _se_two_pass(x_flat, w1_t, b1_r, w2_t, b2_r, inv_hw, bt, hw_tile, vmem_limit,
                 native_mul):
    B, C, HW_pad = x_flat.shape
    Cr = w1_t.shape[1]
    nb = B // bt
    nhw = HW_pad // hw_tile
    elem = jnp.dtype(x_flat.dtype).itemsize
    weight_bytes = (C * Cr + Cr * C + Cr + C) * 4

    # pass 1: pooling reduction over HW tiles ("arbitrary", innermost), finalize.
    cost1 = pl.CostEstimate(
        flops=int(B * C * HW_pad + 4 * B * C * Cr),
        transcendentals=0,
        bytes_accessed=int(B * C * HW_pad * elem + nb * bt * C * 4 + weight_bytes),
    )
    scale = pl.pallas_call(
        _make_pool_scale_kernel(inv_hw),
        out_shape=jax.ShapeDtypeStruct((nb, bt, C), jnp.float32),
        grid_spec=pltpu.PrefetchScalarGridSpec(
            num_scalar_prefetch=0,
            grid=(nb, nhw),
            in_specs=[
                pl.BlockSpec((bt, C, hw_tile), lambda b, h: (b, 0, h)),   # x
                pl.BlockSpec((C, Cr), lambda b, h: (0, 0)),               # w1^T
                pl.BlockSpec((1, Cr), lambda b, h: (0, 0)),               # b1
                pl.BlockSpec((Cr, C), lambda b, h: (0, 0)),               # w2^T
                pl.BlockSpec((1, C), lambda b, h: (0, 0)),                # b2
            ],
            out_specs=pl.BlockSpec((1, bt, C), lambda b, h: (b, 0, 0)),
            scratch_shapes=[pltpu.VMEM((bt, C), jnp.float32)],
        ),
        compiler_params=pltpu.CompilerParams(
            dimension_semantics=("parallel", "arbitrary"),
            vmem_limit_bytes=int(vmem_limit)),
        cost_estimate=cost1,
    )(x_flat, w1_t, b1_r, w2_t, b2_r)

    # pass 2: elementwise broadcast-multiply; pure DMA-bound -> deeper pipeline on x.
    cost2 = pl.CostEstimate(
        flops=int(B * C * HW_pad),
        transcendentals=0,
        bytes_accessed=int(2 * B * C * HW_pad * elem + nb * bt * C * 4),
    )
    out = pl.pallas_call(
        _make_scale_mul_kernel(native_mul),
        out_shape=jax.ShapeDtypeStruct((B, C, HW_pad), x_flat.dtype),
        grid_spec=pltpu.PrefetchScalarGridSpec(
            num_scalar_prefetch=0,
            grid=(nb, nhw),
            in_specs=[
                pl.BlockSpec((1, bt, C), lambda b, h: (b, 0, 0)),                 # scale
                _buffered_block_spec((bt, C, hw_tile), lambda b, h: (b, 0, h), 3),  # x
            ],
            out_specs=pl.BlockSpec((bt, C, hw_tile), lambda b, h: (b, 0, h)),
        ),
        compiler_params=pltpu.CompilerParams(
            dimension_semantics=("parallel", "parallel"),
            vmem_limit_bytes=int(vmem_limit)),
        cost_estimate=cost2,
    )(scale, x_flat)
    return out


# ---------------------------------------------------------------------------
# wrapper
# ---------------------------------------------------------------------------
def squeeze_excite(x, w1, b1, w2, b2, *, force_two_pass=False,
                   hw_tile=None, batch_tile=None):
    """SqueezeExcite forward (matches the PyTorch module, NCHW).

    x : (B, C, H, W)
    w1: (Cr, C), b1: (Cr,)   squeeze_conv (1x1) weight / bias
    w2: (C, Cr), b2: (C,)    excite_conv  (1x1) weight / bias
    batch_tile (if given) is rounded down to a divisor of B; hw_tile to a
    multiple of 128 that fits the per-generation VMEM budget.
    """
    B, C, H, W = x.shape
    Cr = w1.shape[0]
    HW = H * W
    inv_hw = 1.0 / float(HW)      # true HW; any zero-padded lanes sum to 0

    prm = _chip_params()
    elem = jnp.dtype(x.dtype).itemsize
    native_mul = prm["bf16_mul_ok"] and (x.dtype == jnp.bfloat16)

    w1_t = jnp.asarray(w1, jnp.float32).T.reshape(C, Cr)
    w2_t = jnp.asarray(w2, jnp.float32).T.reshape(Cr, C)
    b1_r = jnp.asarray(b1, jnp.float32).reshape(1, Cr)
    b2_r = jnp.asarray(b2, jnp.float32).reshape(1, C)
    weight_bytes = (C * Cr + Cr * C + Cr + C) * 4

    # VMEM footprint of one per-batch (C, HW) slab after layout padding.
    C_pad = _round_up(C, _SUBLANE)
    per_batch_vmem_bytes = C_pad * _round_up(HW, _LANE) * elem
    use_two_pass = force_two_pass or per_batch_vmem_bytes > prm["two_pass_cutoff_bytes"]

    x_flat = x.reshape(B, C, HW)                 # metadata-only reshape
    usable_vmem = prm["vmem_cap_bytes"] - (6 << 20)

    if not use_two_pass:
        # Single-pass: NO padding or slicing; x block spans the full (C, HW) extent,
        # batch tile divides B.  Ragged HW only costs a masked tail store.
        bt = _pick_batch_tile(B, per_batch_vmem_bytes, prm, batch_tile, vmem_mult=4)
        x_block = bt * per_batch_vmem_bytes
        vmem_limit = min(prm["vmem_cap_bytes"],
                         max(4 * x_block + 4 * weight_bytes + (4 << 20), 16 << 20))
        out_flat = _se_single_pass(x_flat, w1_t, b1_r, w2_t, b2_r,
                                   inv_hw, bt, vmem_limit, native_mul)
        return out_flat.reshape(B, C, H, W)

    # Two-pass path (very large spatial only): tile the HW axis.  A ragged HW tail
    # is zero-padded up to hw_tile here (rare at these sizes); the pooled sum uses
    # the true 1/HW so the zeros are harmless, and the pad is sliced off at the end.
    if hw_tile is None:
        hw_tile = (prm["target_tile_bytes"] // max(1, C_pad * elem)) // _LANE * _LANE
    hw_tile = max(_LANE, (int(hw_tile) // _LANE) * _LANE)
    hw_tile = min(hw_tile, _round_up(HW, _LANE))
    while hw_tile > _LANE and 6 * C_pad * hw_tile * elem > usable_vmem:
        hw_tile -= _LANE

    per_batch_block_bytes = C_pad * hw_tile * elem
    bt = _pick_batch_tile(B, per_batch_block_bytes, prm, batch_tile, vmem_mult=6)

    HW_pad = _round_up(HW, hw_tile)
    if HW_pad != HW:
        x_flat = jnp.pad(x_flat, ((0, 0), (0, 0), (0, HW_pad - HW)))

    x_block = bt * per_batch_block_bytes
    vmem_limit = min(prm["vmem_cap_bytes"],
                     max(6 * x_block + 4 * weight_bytes + (4 << 20), 16 << 20))
    out_flat = _se_two_pass(x_flat, w1_t, b1_r, w2_t, b2_r,
                            inv_hw, bt, hw_tile, vmem_limit, native_mul)
    if HW_pad != HW:
        out_flat = out_flat[:, :, :HW]
    return out_flat.reshape(B, C, H, W)


def _reference(x, w1, b1, w2, b2):
    # pure-JAX reference of the PyTorch forward (NCHW)
    pooled = jnp.mean(x, axis=(2, 3))                       # (B, C)
    s = jnp.maximum(pooled @ w1.T + b1, 0.0)                # (B, Cr)
    e = s @ w2.T + b2                                       # (B, C)
    scale = jnp.clip(e + 3.0, 0.0, 6.0) / 6.0
    return x * scale[:, :, None, None]


if __name__ == "__main__":
    key = jax.random.PRNGKey(0)
    k_x, k_w1, k_b1, k_w2, k_b2, k_x2, k_x3 = jax.random.split(key, 7)

    B, C, H, W = 2, 8, 16, 16
    reduction = 4
    Cr = C // reduction

    x = jax.random.normal(k_x, (B, C, H, W), dtype=jnp.float32)
    w1 = jax.random.normal(k_w1, (Cr, C), dtype=jnp.float32) * 0.2   # squeeze_conv.weight
    b1 = jax.random.normal(k_b1, (Cr,), dtype=jnp.float32) * 0.1     # squeeze_conv.bias
    w2 = jax.random.normal(k_w2, (C, Cr), dtype=jnp.float32) * 0.2   # excite_conv.weight
    b2 = jax.random.normal(k_b2, (C,), dtype=jnp.float32) * 0.1      # excite_conv.bias

    ref = _reference(x, w1, b1, w2, b2)

    # 1) default single-pass path (HW multiple of 128)
    out = jax.block_until_ready(squeeze_excite(x, w1, b1, w2, b2))
    assert out.shape == (B, C, H, W)
    assert jnp.allclose(out, ref, atol=1e-5, rtol=1e-5), "single-pass mismatch"

    # 2) two-pass HW-tiled path (forced; hw_tile=128 -> 2 spatial tiles per batch)
    out2 = jax.block_until_ready(
        squeeze_excite(x, w1, b1, w2, b2, force_two_pass=True, hw_tile=128))
    assert jnp.allclose(out2, ref, atol=1e-5, rtol=1e-5), "two-pass mismatch"

    # 3) ragged spatial size (7x7) -> single-pass with NO padding / slicing
    Hs = Ws = 7
    xs = jax.random.normal(k_x2, (B, C, Hs, Ws), dtype=jnp.float32)
    refs = _reference(xs, w1, b1, w2, b2)
    outs = jax.block_until_ready(squeeze_excite(xs, w1, b1, w2, b2))
    assert outs.shape == (B, C, Hs, Ws)
    assert jnp.allclose(outs, refs, atol=1e-5, rtol=1e-5), "ragged-HW mismatch"

    # 4) odd batch size -> batch tile picked as a divisor of B (no batch padding)
    xb = jax.random.normal(k_x3, (3, C, Hs, Ws), dtype=jnp.float32)
    refb = _reference(xb, w1, b1, w2, b2)
    outb = jax.block_until_ready(squeeze_excite(xb, w1, b1, w2, b2))
    assert outb.shape == (3, C, Hs, Ws)
    assert jnp.allclose(outb, refb, atol=1e-5, rtol=1e-5), "odd-batch mismatch"

    # 5) bf16 input (native-dtype multiply on v6e/v7x, f32 path elsewhere)
    xh = x.astype(jnp.bfloat16)
    refh = _reference(xh.astype(jnp.float32), w1, b1, w2, b2)
    outh = jax.block_until_ready(squeeze_excite(xh, w1, b1, w2, b2))
    assert outh.dtype == jnp.bfloat16
    assert jnp.allclose(outh.astype(jnp.float32), refh, atol=6e-2, rtol=6e-2), \
        "bf16 mismatch"

    print("KERNEL_OK")
</pallas_src>

<mosaic_0001>
module attributes {stable_mosaic.version = 11 : i64} {
  func.func @kernel(%arg0: i32, %arg1: memref<1x8x256xf32, #tpu.memory_space<vmem>>, %arg2: memref<8x2xf32, #tpu.memory_space<vmem>>, %arg3: memref<1x2xf32, #tpu.memory_space<vmem>>, %arg4: memref<2x8xf32, #tpu.memory_space<vmem>>, %arg5: memref<1x8xf32, #tpu.memory_space<vmem>>, %arg6: memref<1x8x256xf32, #tpu.memory_space<vmem>>) attributes {dimension_semantics = [#tpu.dimension_semantics<parallel>], iteration_bounds = array<i64: 2>, scalar_prefetch = 0 : i64, scratch_operands = 0 : i64, tpu.core_type = #tpu.core_type<tc>, window_params = [{transform_indices = @transform_0, window_bounds = array<i64: 1, 8, 256>}, {pipeline_mode = #tpu.pipeline_mode<synchronous>, transform_indices = @transform_1, window_bounds = array<i64: 8, 2>}, {pipeline_mode = #tpu.pipeline_mode<synchronous>, transform_indices = @transform_2, window_bounds = array<i64: 1, 2>}, {pipeline_mode = #tpu.pipeline_mode<synchronous>, transform_indices = @transform_3, window_bounds = array<i64: 2, 8>}, {pipeline_mode = #tpu.pipeline_mode<synchronous>, transform_indices = @transform_4, window_bounds = array<i64: 1, 8>}, {transform_indices = @transform_5, window_bounds = array<i64: 1, 8, 256>}]} {
    %c0 = arith.constant 0 : index
    %c0_0 = arith.constant 0 : index
    %c0_1 = arith.constant 0 : index
    %0 = vector.load %arg1[%c0, %c0_0, %c0_1] : memref<1x8x256xf32, #tpu.memory_space<vmem>>, vector<1x8x256xf32>
    %cst = arith.constant dense<0.000000e+00> : vector<1x8xf32>
    %1 = vector.multi_reduction <add>, %0, %cst [2] : vector<1x8x256xf32> to vector<1x8xf32>
    %cst_2 = arith.constant 3.906250e-03 : f32
    %2 = vector.broadcast %cst_2 : f32 to vector<1x8xf32>
    %3 = arith.mulf %1, %2 : vector<1x8xf32>
    %c0_3 = arith.constant 0 : index
    %c0_4 = arith.constant 0 : index
    %4 = vector.load %arg2[%c0_3, %c0_4] : memref<8x2xf32, #tpu.memory_space<vmem>>, vector<8x2xf32>
    %cst_5 = arith.constant dense<0.000000e+00> : vector<1x2xf32>
    %5 = tpu.matmul %3, %4, %cst_5 {dimension_numbers = #tpu.dot_dimension_numbers<[1], [0], [0], [1], [0, 0, 1, 1], [], []>} : vector<1x8xf32>, vector<8x2xf32>, vector<1x2xf32> -> vector<1x2xf32>
    %c0_6 = arith.constant 0 : index
    %c0_7 = arith.constant 0 : index
    %6 = vector.load %arg3[%c0_6, %c0_7] : memref<1x2xf32, #tpu.memory_space<vmem>>, vector<1x2xf32>
    %7 = arith.addf %5, %6 : vector<1x2xf32>
    %cst_8 = arith.constant 0.000000e+00 : f32
    %8 = vector.broadcast %cst_8 : f32 to vector<1x2xf32>
    %9 = arith.maximumf %7, %8 : vector<1x2xf32>
    %c0_9 = arith.constant 0 : index
    %c0_10 = arith.constant 0 : index
    %10 = vector.load %arg4[%c0_9, %c0_10] : memref<2x8xf32, #tpu.memory_space<vmem>>, vector<2x8xf32>
    %cst_11 = arith.constant dense<0.000000e+00> : vector<1x8xf32>
    %11 = tpu.matmul %9, %10, %cst_11 {dimension_numbers = #tpu.dot_dimension_numbers<[1], [0], [0], [1], [0, 0, 1, 1], [], []>} : vector<1x2xf32>, vector<2x8xf32>, vector<1x8xf32> -> vector<1x8xf32>
    %c0_12 = arith.constant 0 : index
    %c0_13 = arith.constant 0 : index
    %12 = vector.load %arg5[%c0_12, %c0_13] : memref<1x8xf32, #tpu.memory_space<vmem>>, vector<1x8xf32>
    %13 = arith.addf %11, %12 : vector<1x8xf32>
    %cst_14 = arith.constant 3.000000e+00 : f32
    %14 = vector.broadcast %cst_14 : f32 to vector<1x8xf32>
    %15 = arith.addf %13, %14 : vector<1x8xf32>
    %cst_15 = arith.constant 0.000000e+00 : f32
    %cst_16 = arith.constant 6.000000e+00 : f32
    %16 = vector.broadcast %cst_15 : f32 to vector<1x8xf32>
    %17 = arith.maximumf %16, %15 : vector<1x8xf32>
    %18 = vector.broadcast %cst_16 : f32 to vector<1x8xf32>
    %19 = arith.minimumf %18, %17 : vector<1x8xf32>
    %cst_17 = arith.constant 0.166666672 : f32
    %20 = vector.broadcast %cst_17 : f32 to vector<1x8xf32>
    %21 = arith.mulf %19, %20 : vector<1x8xf32>
    %c0_18 = arith.constant 0 : index
    %c0_19 = arith.constant 0 : index
    %c0_20 = arith.constant 0 : index
    %22 = vector.load %arg1[%c0_18, %c0_19, %c0_20] : memref<1x8x256xf32, #tpu.memory_space<vmem>>, vector<1x8x256xf32>
    %23 = vector.shape_cast %21 : vector<1x8xf32> to vector<1x8x1xf32>
    %24 = vector.broadcast %23 : vector<1x8x1xf32> to vector<1x8x256xf32>
    %25 = arith.mulf %22, %24 : vector<1x8x256xf32>
    %c0_21 = arith.constant 0 : index
    %c0_22 = arith.constant 0 : index
    %c0_23 = arith.constant 0 : index
    %26 = vector.load %arg6[%c0_21, %c0_22, %c0_23] : memref<1x8x256xf32, #tpu.memory_space<vmem>>, vector<1x8x256xf32>
    tpu.vector_store %arg6[%c0_21, %c0_22, %c0_23], %25 {strides = array<i32>} : memref<1x8x256xf32, #tpu.memory_space<vmem>>, vector<1x8x256xf32>,
    return
  }
  func.func @transform_0(%arg0: i32) -> (i32, i32, i32) {
    %c0_i32 = arith.constant 0 : i32
    %c0_i32_0 = arith.constant 0 : i32
    %c0_i32_1 = arith.constant 0 : i32
    return %arg0, %c0_i32, %c0_i32_0 : i32, i32, i32
  }
  func.func @transform_1(%arg0: i32) -> (i32, i32) {
    %c0_i32 = arith.constant 0 : i32
    %c0_i32_0 = arith.constant 0 : i32
    %c0_i32_1 = arith.constant 0 : i32
    return %c0_i32, %c0_i32_0 : i32, i32
  }
  func.func @transform_2(%arg0: i32) -> (i32, i32) {
    %c0_i32 = arith.constant 0 : i32
    %c0_i32_0 = arith.constant 0 : i32
    %c0_i32_1 = arith.constant 0 : i32
    return %c0_i32, %c0_i32_0 : i32, i32
  }
  func.func @transform_3(%arg0: i32) -> (i32, i32) {
    %c0_i32 = arith.constant 0 : i32
    %c0_i32_0 = arith.constant 0 : i32
    %c0_i32_1 = arith.constant 0 : i32
    return %c0_i32, %c0_i32_0 : i32, i32
  }
  func.func @transform_4(%arg0: i32) -> (i32, i32) {
    %c0_i32 = arith.constant 0 : i32
    %c0_i32_0 = arith.constant 0 : i32
    %c0_i32_1 = arith.constant 0 : i32
    return %c0_i32, %c0_i32_0 : i32, i32
  }
  func.func @transform_5(%arg0: i32) -> (i32, i32, i32) {
    %c0_i32 = arith.constant 0 : i32
    %c0_i32_0 = arith.constant 0 : i32
    %c0_i32_1 = arith.constant 0 : i32
    return %arg0, %c0_i32, %c0_i32_0 : i32, i32, i32
  }
}

</mosaic_0001>

<bundles_post_ra>
// kernel: tpu_custom_call.1
= control target key start
LH: loop header
LB: loop body
LE: loop exit
PB: predicated region body
PF: predicated region fallthrough
CT: control target
= control target key end

     0   :  { %10 = vsyncpa [#allocation3], 0  ;;  %s900_s0 = inlined_call_operand.hbm [shape: f32[2,8,256], index: 0, kind: input, shape index: {}]   ;;  %s901_s1 = inlined_call_operand.vmem [shape: f32[8,2], index: 1, kind: input, shape index: {}]   ;;  %s902_s2 = inlined_call_operand.vmem [shape: f32[1,2], index: 2, kind: input, shape index: {}]   ;;  %s903_s3 = inlined_call_operand.vmem [shape: f32[2,8], index: 3, kind: input, shape index: {}]   ;;  %s904_s4 = inlined_call_operand.vmem [shape: f32[1,8], index: 4, kind: input, shape index: {}]   ;;  %s905_s5 = inlined_call_operand.hbm [shape: f32[2,8,256], index: 5, kind: output, shape index: {}]  }
   0x1   :  { %12 = vsyncpa [#allocation3 + $0x1], 0 }
   0x2   :  { %13 = vsyncpa [#allocation4], 0 }
   0x3   :  { %15 = vsyncpa [#allocation4 + $0x1], 0  ;;  %s723_s18 = smov 0   ;;  %s725_s19 = smov 0  }
   0x4   :  { %s727_s20 = smov 0   ;;  %s729_s21 = smov 0  }
   0x5 LB: > { %s744_s22 = sadd.s32 4294967295, %s687_s21   ;;  %s510_s23 = sadd.s32 4294967294, %s687_s21   ;;  %s687_s21 = sphi %s729_s21, %s920_s21   ;;  %s683_s20 = sphi %s727_s20, %s919_s20   ;;  %s679_s19 = sphi %s725_s19, %s918_s19   ;;  %s675_s18 = sphi %s723_s18, %s917_s18  }
   0x6   : > { %s748_s24 = sadd.s32 1, %s687_s21   ;;  %s28_s25 = sadd.s32 1, %s683_s20 }
   0x7   : > { %s25_s26 = ssub.s32 %s687_s21, %s748_s24  ;;  %p35_p0 = scmp.ne.s32.totalorder %s683_s20, %s679_s19 }
   0x8   : > { %p26_p1 = scmp.eq.s32.totalorder %s25_s26, 0  ;;  %p36_p2 = scmp.eq.s32.totalorder %s687_s21, 0 }
   0x9   : > { %p41_p3 = scmp.ne.s32.totalorder %s679_s19, %s675_s18  ;;  %p42_p4 = scmp.eq.s32.totalorder %s744_s22, 0 }
   0xa   : > { %s760_s27 = scalar_select %p26_p1, %s683_s20, %s28_s25  }
   0xb   : > { %p762_p5 = por %p36_p2, %p35_p0  ;;  %p766_p6 = por %p42_p4, %p41_p3 }
   0xc   : > { %p149_p7 = scmp.eq.s32.totalorder %s744_s22, 1  ;;  %p155_p8 = scmp.eq.s32.totalorder %s510_s23, 1 }
   0xd   : > { %p555_p10 = scmp.lt.s32.totalorder %s687_s21, 2  ;;  %s187_s7 = sand.u32 1, %s683_s20  }
   0xe   : > { %p773_p11 = por %p149_p7, %p35_p0  ;;  %p777_p12 = por %p155_p8, %p41_p3 }
   0xf   : > { %s527_s8 = sshll.u32 %s687_s21, 8  ;;  %s513_s9 = sshll.u32 %s187_s7, 4 }
  0x10   : > { %s909_s30 = scalar_select %p773_p11, 1, 0 }
  0x11   : > { %s910_s6 = scalar_select %p777_p12, 1, 0 }
  0x12   : > { %s786_s12 = scalar_lea.hbm %s900_s0, %s527_s8  ;;  %s191_s13 = scalar_lea.vmem [#allocation2], %s513_s9 }
  0x13   : > { %s199_s14 = sshll.u32 %s191_s13, 4  ;;  %p790_p13 = pnand %p555_p10, %p762_p5  ;;  %s794_s14 = int_to_ptr.vmem [resolvable:$true] %s199_s14 }
  0x14   : > { %s188_s16 = scalar_lea.sflag [#allocation3], %s187_s7  ;;  %s591_s17 = scalar_lea.hbm %s786_s12, 256 }
  0x15   : > { %p592_p2 = scmp.ne.s32.totalorder %s786_s12, %s591_s17  ;;  %p593_p3 = pneg %p790_p13 }
  0x16   : > { %s596_s26 = scalar_lea.hbm %s900_s0, 512  ;;  %p597_p5 = scmp.lt.u32.totalorder %s786_s12, %s900_s0 }
  0x17   : > { %p594_p4 = pnand %p593_p3, %p592_p2  ;;  %p598_p8 = scmp.lt.u32.totalorder %s596_s26, %s591_s17 }
  0x18   : > { %p600_p9 = scmp.lt.u32.totalorder %s591_s17, %s786_s12 }
  0x19   : > { %p595_p7 = pneg %p594_p4  ;;  %p599_p10 = por %p598_p8, %p597_p5 }
  0x1b   : > { %p601_p0 = por %p600_p9, %p599_p10 }
  0x1d   : > { %p602_p1 = pnand %p601_p0, %p595_p7 }
  0x1f   : > { %605 = shalt.err (!%p602_p1)
}
  0x20   : > { %s606_s7 = scalar_lea.vmem %s794_s14, 256  ;;  %s689_s9 = smov [#allocation2]  }
  0x21   : > { %p607_p2 = scmp.ne.s32.totalorder %s794_s14, %s606_s7  ;;  %s611_s10 = sshll.u32 %s689_s9, 4  ;;  %s612_s10 = int_to_ptr.vmem [resolvable:$false] %s611_s10 }
  0x22   : > { %s613_s11 = scalar_lea.vmem %s612_s10, 512  ;;  %p614_p11 = scmp.lt.s32.totalorder %s794_s14, %s612_s10 }
  0x23   : > { %p609_p4 = pnand %p607_p2, %p593_p3  ;;  %p615_p5 = scmp.lt.s32.totalorder %s613_s11, %s606_s7 }
  0x25   : > { %p610_p12 = pneg %p609_p4  ;;  %p616_p8 = por %p615_p5, %p614_p11 }
  0x27   : > { %p617_p9 = pnand %p616_p8, %p610_p12 }
  0x29   : > { %620 = shalt.err (!%p617_p9)
}
  0x2a   : > { %550 = dma.hbm_to_vmem [thread:$0]  (!%p790_p13), %s786_s12, 256, %s794_s14, %s188_s16  }
  0x2b   : > { %p912_p0 = scmp.lt.s32.totalorder %s687_s21, 3  ;;  %p913_p1 = scmp.ge.s32.totalorder %s687_s21, 1 }
  0x2d   : > { %p205_p3 = pnand %p913_p1, %p912_p0 }
  0x2e   : > { %s828_s13 = sand.u32 (!%p205_p3), 1, %s679_s19  }
  0x2f   : > { %208 = sbr.rel (%p205_p3) target bundleno = 775 (0x307), region = 40  ;;  %s517_s17 = sshll.u32 (!%p205_p3), %s828_s13, 4 }
  0x30   : > { %s211_s23 = scalar_lea.sflag (!%p205_p3), [#allocation3], %s828_s13  ;;  %s214_s15 = scalar_lea.vmem (!%p205_p3), [#allocation2], %s517_s17 }
  0x36   : > { %666 = dma.done.wait (%p766_p6), %s211_s23, 256  }
  0x37   : > { %668 = vsyncadd (%p766_p6), %s211_s23, 4294967040  ;;  %v241_v0 = vld [vmem:[%s214_s15] sm:$0xff]  ;;  %v242_v1 = vld [vmem:[%s214_s15 + $0x8] sm:$0xff]  ;;  %v690_v3 = vmov 0.0   ;;  %vm691_vm0 = vmmov 0   ;;  %v250_v5 = vlaneseq  ;;  %vm256_vm1 = vcmask 64512  }
  0x38   : > { %v243_v2 = vadd.f32 %v242_v1, %v241_v0  ;;  %533 = vmatprep.subr.mxu0 %v690_v3  ;;  %v247_v4 = vld [vmem:[%s901_s1] sm:$0xff]  ;;  %538 = vmatprep.subr.mxu1 %v690_v3  ;;  %vm336_vm2 = vcmask 1041408   ;;  %vm332_vm3 = vcmask 15360   ;;  %s528_s7 = sshll.u32 %s744_s22, 8  ;;  %s240_s9 = scalar_lea.vmem [#allocation5], %s517_s17 }
  0x39   : > { %534 = vmatpush3.msra.mxu0 %v247_v4  ;;  %535 = vmatprep.mubr.msk.f32.mxu0 %vm691_vm0, %v690_v3  ;;  %v251_v6 = vand.u32 127, %v250_v5  ;;  %v253_v7 = vshrl.u32 %v250_v5, 7  ;;  %v330_v12 = vld [vmem:[%s903_s3] sm:$0x3]  ;;  %s440_s10 = sshll.u32 %s240_s9, 4  ;;  %s856_s15 = scalar_lea.hbm %s905_s5, %s528_s7  ;;  %s858_s10 = int_to_ptr.vmem [resolvable:$true] %s440_s10 }
  0x3a   : > { %244 = vadd.xlane.f32.xlu0 %v243_v2  ;;  %540 = vmatprep.mubr.msk.f32.mxu1 %vm691_vm0, %v690_v3  ;;  %v248_v13 = vld [vmem:[%s902_s2] sm:$0x1]  ;;  %s426_s12 = scalar_lea.sflag [#allocation4], %s828_s13  ;;  %s621_s22 = scalar_lea.vmem %s858_s10, 256 }
  0x3b   : > { %v254_v8 = vsub.s32 %v251_v6, %v253_v7  ;;  %539 = vmatpush3.msk.msra.mxu1 %vm336_vm2, %v330_v12  ;;  %v331_v18 = vld [vmem:[%s904_s4] sm:$0x1]  ;;  %v416_v25 = vsub.s32 0, %v253_v7  ;;  %p622_p6 = scmp.ne.s32.totalorder %s858_s10, %s621_s22  ;;  %p914_p11 = scmp.ne.s32.totalorder %s909_s30, 0 }
  0x3c   : > { %s692_s17 = smov [#allocation5]  }
  0x3d   : > { %p623_p12 = pnand %p622_p6, %p914_p11  ;;  %s625_s14 = sshll.u32 %s692_s17, 4  ;;  %s626_s14 = int_to_ptr.vmem [resolvable:$false] %s625_s14 }
  0x3e   : > { %s627_s29 = scalar_lea.vmem %s626_s14, 512  ;;  %p628_p7 = scmp.lt.s32.totalorder %s858_s10, %s626_s14 }
  0x3f   : > { %p624_p13 = pneg %p623_p12  ;;  %p629_p10 = scmp.lt.s32.totalorder %s627_s29, %s621_s22 }
  0x41   : > { %p630_p2 = por %p629_p10, %p628_p7 }
  0x43   : > { %p631_p4 = pnand %p630_p2, %p624_p13 }
  0xc7   : > { %v245_v9 = vpop.xlane.xlu0 %244 }
  0xc8   : > { %v246_v10 = vmul.f32 0.00390625, %v245_v9 }
  0xca   : > { %v255_v11 = vrot.slane %v246_v10, %v254_v8 }
  0xcc   : > { %536 = vmatmul.mubr.msk.f32.vlgmr.msra.gmra.mrb[0].mxu0 %vm256_vm1, %v255_v11 }
 0x19f   : > { %v325_v14 = vpop.f32.mrb[0].mxu0 }
 0x1a0   : > { %v326_v15 = vadd.f32 %v325_v14, %v248_v13  ;;  %v537_v16 = vpop.f32.mrb[1].mxu0 }
 0x1a2   : > { %v329_v17 = vmax.f32 %v326_v15, 0.0 }
 0x1a4   : > { %541 = vmatmul.mubr.msk.f32.vlgmr.msra.gmra.mrb[0].mxu1 %vm332_vm3, %v329_v17 }
 0x277   : > { %v406_v19 = vpop.f32.mrb[0].mxu1 }
 0x278   : > { %v407_v20 = vadd.f32 %v406_v19, %v331_v18  ;;  %v542_v21 = vpop.f32.mrb[1].mxu1 }
 0x27a   : > { %v410_v22 = vadd.f32 3.0, %v407_v20 }
 0x27c   : > { %v411_v23 = vmax.f32 %v410_v22, 0.0 }
 0x27e   : > { %v412_v24 = vmin.f32 %v411_v23, 6.0 }
 0x280   : > { %v413_v26 = vmul.f32 0.16666667, %v412_v24 }
 0x282   : > { %v417_v27 = vrot.slane %v413_v26, %v416_v25 }
 0x284   : > { %419 = vbcast.lane.b32.xlu0 %v417_v27, 256 }
 0x2f6   : > { %v420_v28 = vpop.permute.xlu0 %419 }
 0x2f7   : > { %v421_v29 = vmul.f32 %v420_v28, %v241_v0  ;;  %v422_v30 = vmul.f32 %v420_v28, %v242_v1 }
 0x2f9   : > { %423 = vst [vmem:[%s240_s9] sm:$0xff] %v421_v29  ;;  %424 = vst [vmem:[%s240_s9 + $0x8] sm:$0xff] %v422_v30 }
 0x2fa   : > { %634 = shalt.err (!%p631_p4)
}
 0x2fb   : > { %s635_s13 = scalar_lea.hbm %s856_s15, 256  ;;  %s639_s26 = scalar_lea.hbm %s905_s5, 512 }
 0x2fc   : > { %p636_p5 = scmp.ne.s32.totalorder %s856_s15, %s635_s13  ;;  %p640_p0 = scmp.lt.u32.totalorder %s856_s15, %s905_s5 }
 0x2fd   : > { %p641_p1 = scmp.lt.u32.totalorder %s639_s26, %s635_s13  ;;  %p643_p6 = scmp.lt.u32.totalorder %s635_s13, %s856_s15 }
 0x2fe   : > { %p637_p8 = pnand %p636_p5, %p914_p11 }
 0x2ff   : > { %p642_p3 = por %p641_p1, %p640_p0 }
 0x300   : > { %p638_p9 = pneg %p637_p8 }
 0x301   : > { %p644_p12 = por %p643_p6, %p642_p3 }
 0x303   : > { %p645_p13 = pnand %p644_p12, %p638_p9 }
 0x305   : > { %648 = shalt.err (!%p645_p13)
}
 0x306   : > { %545 = dma.vmem_to_hbm [thread:$0]  (%p914_p11), %s858_s10, 256, %s856_s15, %s426_s12  }
 0x307 PF: > { %s452_s7 = sand.u32 1, %s675_s18   ;;  %p915_p7 = scmp.ne.s32.totalorder %s910_s6, 0 }
 0x308   : > { %p916_p10 = scmp.ge.s32.totalorder %s687_s21, 2  ;;  %s453_s9 = scalar_lea.sflag [#allocation4], %s452_s7 }
 0x30a   : > { %p552_p2 = pnand %p916_p10, %p915_p7 }
 0x30c   : > { %670 = dma.done.wait (!%p552_p2), %s453_s9, 256  }
 0x30d   : > { %672 = vsyncadd (!%p552_p2), %s453_s9, 4294967040  ;;  %p18_p4 = scmp.ge.s32.totalorder %s748_s24, 4   ;;  %s917_s18 = smov %s679_s19 }
 0x30e   : > { %s918_s19 = smov %s683_s20  ;;  %s919_s20 = smov %s760_s27 }
 0x30f   : > { %s920_s21 = smov %s748_s24  ;;  %20 = sbr.rel (!%p18_p4) target bundleno = 5 (0x5), region = 85 }
 0x316   :  { %458 = vsyncpa [#allocation3], 1 }
 0x317   :  { %460 = vsyncpa [#allocation3 + $0x1], 1 }
 0x318   :  { %461 = vsyncpa [#allocation4], 1 }
 0x319   :  { %463 = vsyncpa [#allocation4 + $0x1], 1 }

</bundles_post_ra>
